<compile_context>
chip_gen: v5e
topology: v5e:2x2
jax: 0.10.0
libtpu: 0.0.40
codegen_flags: <defaults>
</compile_context>

<pallas_src>
import math

import jax
import jax.numpy as jnp
from jax.experimental import pallas as pl
from jax.experimental.pallas import tpu as pltpu

HIDDEN = 256
OUT_PAD = 128          # lane-dense fc3 output width (column 0 holds the Q value)
MAX_BATCH_TILE = 256   # batch tile for the grid


def _q_kernel(s_ref, a_ref,
              w1s_ref, w1a_ref, b1_ref,
              w2_ref, b2_ref,
              w3_ref, b3_ref,
              o_ref):
    # fc1 + ReLU.  concat(s, a) @ W1 == s @ W1[:S] + a @ W1[S:]  (exact).
    h1 = jnp.dot(s_ref[...], w1s_ref[...], preferred_element_type=jnp.float32)
    h1 = h1 + jnp.dot(a_ref[...], w1a_ref[...],
                      preferred_element_type=jnp.float32)
    h1 = jnp.maximum(h1 + b1_ref[...], 0.0)
    # fc2 + ReLU
    h2 = jnp.dot(h1.astype(jnp.bfloat16), w2_ref[...],
                 preferred_element_type=jnp.float32)
    h2 = jnp.maximum(h2 + b2_ref[...], 0.0)
    # fc3: padded to 128 output lanes (bias folded into the padded bias row) so
    # the store is unmasked / lane-dense.
    o = jnp.dot(h2.astype(jnp.bfloat16), w3_ref[...],
                preferred_element_type=jnp.float32) + b3_ref[...]
    o_ref[...] = o.astype(o_ref.dtype)


def q_forward(s, a, params, *, state_dim, action_dim):
    """SAC Q forward: s (.., state_dim), a (.., action_dim) -> (B, 1) float32."""
    w1, b1, w2, b2, w3, b3 = params

    s = s.reshape(-1, state_dim).astype(jnp.float32)
    a = a.reshape(-1, action_dim).astype(jnp.float32)
    batch = s.shape[0]

    # ---- pack params for the kernel (bf16 matmul operands, padded fc3) -----
    w1s = w1[:state_dim].astype(jnp.bfloat16)          # (state_dim, 256)
    w1a = w1[state_dim:].astype(jnp.bfloat16)          # (action_dim, 256)
    w2k = w2.astype(jnp.bfloat16)
    w3k = jnp.zeros((HIDDEN, OUT_PAD), jnp.bfloat16).at[:, :1].set(
        w3.astype(jnp.bfloat16))
    b1k = b1.astype(jnp.float32)
    b2k = b2.astype(jnp.float32)
    b3k = jnp.zeros((1, OUT_PAD), jnp.float32).at[:, :1].set(
        b3.astype(jnp.float32))

    # ---- batch tiling -------------------------------------------------------
    if batch <= MAX_BATCH_TILE:
        tb = max(8, -(-batch // 8) * 8)          # round up to sublane multiple
        b_pad = tb
    else:
        tb = MAX_BATCH_TILE
        b_pad = -(-batch // tb) * tb
    if b_pad != batch:
        s = jnp.pad(s, ((0, b_pad - batch), (0, 0)))
        a = jnp.pad(a, ((0, b_pad - batch), (0, 0)))
    sk = s.astype(jnp.bfloat16)
    ak = a.astype(jnp.bfloat16)

    const2d = lambda shape: pl.BlockSpec(shape, lambda i: (0, 0))

    out = pl.pallas_call(
        _q_kernel,
        out_shape=jax.ShapeDtypeStruct((b_pad, OUT_PAD), jnp.float32),
        grid=(b_pad // tb,),
        in_specs=[
            pl.BlockSpec((tb, state_dim), lambda i: (i, 0)),
            pl.BlockSpec((tb, action_dim), lambda i: (i, 0)),
            const2d(w1s.shape), const2d(w1a.shape), const2d(b1k.shape),
            const2d(w2k.shape), const2d(b2k.shape),
            const2d(w3k.shape), const2d(b3k.shape),
        ],
        out_specs=pl.BlockSpec((tb, OUT_PAD), lambda i: (i, 0)),
        compiler_params=pltpu.CompilerParams(
            dimension_semantics=("parallel",)),
    )(sk, ak, w1s, w1a, b1k, w2k, b2k, w3k, b3k)

    return out[:batch, :1]


def init_q_params(key, state_dim, action_dim):
    """PyTorch nn.Linear default init (uniform ±1/sqrt(fan_in)).

    Weights stored as (in_features, out_features) — transpose of torch layout.
    Biases stored as (1, out_features).
    """
    def linear(k, fan_in, fan_out):
        kw, kb = jax.random.split(k)
        bound = 1.0 / math.sqrt(fan_in)
        w = jax.random.uniform(kw, (fan_in, fan_out), jnp.float32, -bound, bound)
        b = jax.random.uniform(kb, (1, fan_out), jnp.float32, -bound, bound)
        return w, b

    in_dim = state_dim + action_dim
    k1, k2, k3 = jax.random.split(key, 3)
    w1, b1 = linear(k1, in_dim, HIDDEN)
    w2, b2 = linear(k2, HIDDEN, HIDDEN)
    w3, b3 = linear(k3, HIDDEN, 1)
    return (w1, b1, w2, b2, w3, b3)


def q_reference(s, a, params, *, state_dim, action_dim):
    """Pure-JAX f32 reference (same math as the PyTorch module)."""
    w1, b1, w2, b2, w3, b3 = params
    s = s.reshape(-1, state_dim)
    a = a.reshape(-1, action_dim)
    x = jnp.concatenate((s, a), axis=-1)
    h = jnp.maximum(x @ w1 + b1, 0.0)
    h = jnp.maximum(h @ w2 + b2, 0.0)
    return h @ w3 + b3


if __name__ == "__main__":
    key = jax.random.PRNGKey(0)
    k_params, k_s, k_a = jax.random.split(key, 3)

    batch = 8
    state_dim = 32   # env.num_obs stand-in
    action_dim = 12  # env.num_acts stand-in

    params = init_q_params(k_params, state_dim, action_dim)
    s = jax.random.normal(k_s, (batch, state_dim), dtype=jnp.float32)
    a = jax.random.normal(k_a, (batch, action_dim), dtype=jnp.float32)

    out = q_forward(s, a, params, state_dim=state_dim, action_dim=action_dim)
    out = jax.block_until_ready(out)

    ref = q_reference(s, a, params, state_dim=state_dim, action_dim=action_dim)
    assert out.shape == (batch, 1), out.shape
    # bf16 matmul operands (f32 accumulation) => loosened tolerance vs f32 ref.
    assert jnp.allclose(out, ref, atol=1e-2, rtol=5e-2), "mismatch vs reference"

    print("KERNEL_OK")
</pallas_src>

<mosaic_0001>
module attributes {stable_mosaic.version = 11 : i64} {
  func.func @_q_kernel(%arg0: i32, %arg1: memref<8x32xbf16, #tpu.memory_space<vmem>>, %arg2: memref<8x12xbf16, #tpu.memory_space<vmem>>, %arg3: memref<32x256xbf16, #tpu.memory_space<vmem>>, %arg4: memref<12x256xbf16, #tpu.memory_space<vmem>>, %arg5: memref<1x256xf32, #tpu.memory_space<vmem>>, %arg6: memref<256x256xbf16, #tpu.memory_space<vmem>>, %arg7: memref<1x256xf32, #tpu.memory_space<vmem>>, %arg8: memref<256x128xbf16, #tpu.memory_space<vmem>>, %arg9: memref<1x128xf32, #tpu.memory_space<vmem>>, %arg10: memref<8x128xf32, #tpu.memory_space<vmem>>) attributes {dimension_semantics = [#tpu.dimension_semantics<parallel>], iteration_bounds = array<i64: 1>, scalar_prefetch = 0 : i64, scratch_operands = 0 : i64, tpu.core_type = #tpu.core_type<tc>, window_params = [{transform_indices = @transform_0, window_bounds = array<i64: 8, 32>}, {transform_indices = @transform_1, window_bounds = array<i64: 8, 12>}, {pipeline_mode = #tpu.pipeline_mode<synchronous>, transform_indices = @transform_2, window_bounds = array<i64: 32, 256>}, {pipeline_mode = #tpu.pipeline_mode<synchronous>, transform_indices = @transform_3, window_bounds = array<i64: 12, 256>}, {pipeline_mode = #tpu.pipeline_mode<synchronous>, transform_indices = @transform_4, window_bounds = array<i64: 1, 256>}, {pipeline_mode = #tpu.pipeline_mode<synchronous>, transform_indices = @transform_5, window_bounds = array<i64: 256, 256>}, {pipeline_mode = #tpu.pipeline_mode<synchronous>, transform_indices = @transform_6, window_bounds = array<i64: 1, 256>}, {pipeline_mode = #tpu.pipeline_mode<synchronous>, transform_indices = @transform_7, window_bounds = array<i64: 256, 128>}, {pipeline_mode = #tpu.pipeline_mode<synchronous>, transform_indices = @transform_8, window_bounds = array<i64: 1, 128>}, {transform_indices = @transform_9, window_bounds = array<i64: 8, 128>}]} {
    %c0 = arith.constant 0 : index
    %c0_0 = arith.constant 0 : index
    %0 = vector.load %arg1[%c0, %c0_0] : memref<8x32xbf16, #tpu.memory_space<vmem>>, vector<8x32xbf16>
    %c0_1 = arith.constant 0 : index
    %c0_2 = arith.constant 0 : index
    %1 = vector.load %arg3[%c0_1, %c0_2] : memref<32x256xbf16, #tpu.memory_space<vmem>>, vector<32x256xbf16>
    %cst = arith.constant dense<0.000000e+00> : vector<8x256xf32>
    %2 = tpu.matmul %0, %1, %cst {dimension_numbers = #tpu.dot_dimension_numbers<[1], [0], [0], [1], [0, 0, 1, 1], [], []>} : vector<8x32xbf16>, vector<32x256xbf16>, vector<8x256xf32> -> vector<8x256xf32>
    %c0_3 = arith.constant 0 : index
    %c0_4 = arith.constant 0 : index
    %3 = vector.load %arg2[%c0_3, %c0_4] : memref<8x12xbf16, #tpu.memory_space<vmem>>, vector<8x12xbf16>
    %c0_5 = arith.constant 0 : index
    %c0_6 = arith.constant 0 : index
    %4 = vector.load %arg4[%c0_5, %c0_6] : memref<12x256xbf16, #tpu.memory_space<vmem>>, vector<12x256xbf16>
    %cst_7 = arith.constant dense<0.000000e+00> : vector<8x256xf32>
    %5 = tpu.matmul %3, %4, %cst_7 {dimension_numbers = #tpu.dot_dimension_numbers<[1], [0], [0], [1], [0, 0, 1, 1], [], []>} : vector<8x12xbf16>, vector<12x256xbf16>, vector<8x256xf32> -> vector<8x256xf32>
    %6 = arith.addf %2, %5 : vector<8x256xf32>
    %c0_8 = arith.constant 0 : index
    %c0_9 = arith.constant 0 : index
    %7 = vector.load %arg5[%c0_8, %c0_9] : memref<1x256xf32, #tpu.memory_space<vmem>>, vector<1x256xf32>
    %8 = vector.broadcast %7 : vector<1x256xf32> to vector<8x256xf32>
    %9 = arith.addf %6, %8 : vector<8x256xf32>
    %cst_10 = arith.constant 0.000000e+00 : f32
    %10 = vector.broadcast %cst_10 : f32 to vector<8x256xf32>
    %11 = arith.maximumf %9, %10 : vector<8x256xf32>
    %12 = arith.truncf %11 : vector<8x256xf32> to vector<8x256xbf16>
    %c0_11 = arith.constant 0 : index
    %c0_12 = arith.constant 0 : index
    %13 = vector.load %arg6[%c0_11, %c0_12] : memref<256x256xbf16, #tpu.memory_space<vmem>>, vector<256x256xbf16>
    %cst_13 = arith.constant dense<0.000000e+00> : vector<8x256xf32>
    %14 = tpu.matmul %12, %13, %cst_13 {dimension_numbers = #tpu.dot_dimension_numbers<[1], [0], [0], [1], [0, 0, 1, 1], [], []>} : vector<8x256xbf16>, vector<256x256xbf16>, vector<8x256xf32> -> vector<8x256xf32>
    %c0_14 = arith.constant 0 : index
    %c0_15 = arith.constant 0 : index
    %15 = vector.load %arg7[%c0_14, %c0_15] : memref<1x256xf32, #tpu.memory_space<vmem>>, vector<1x256xf32>
    %16 = vector.broadcast %15 : vector<1x256xf32> to vector<8x256xf32>
    %17 = arith.addf %14, %16 : vector<8x256xf32>
    %cst_16 = arith.constant 0.000000e+00 : f32
    %18 = vector.broadcast %cst_16 : f32 to vector<8x256xf32>
    %19 = arith.maximumf %17, %18 : vector<8x256xf32>
    %20 = arith.truncf %19 : vector<8x256xf32> to vector<8x256xbf16>
    %c0_17 = arith.constant 0 : index
    %c0_18 = arith.constant 0 : index
    %21 = vector.load %arg8[%c0_17, %c0_18] : memref<256x128xbf16, #tpu.memory_space<vmem>>, vector<256x128xbf16>
    %cst_19 = arith.constant dense<0.000000e+00> : vector<8x128xf32>
    %22 = tpu.matmul %20, %21, %cst_19 {dimension_numbers = #tpu.dot_dimension_numbers<[1], [0], [0], [1], [0, 0, 1, 1], [], []>} : vector<8x256xbf16>, vector<256x128xbf16>, vector<8x128xf32> -> vector<8x128xf32>
    %c0_20 = arith.constant 0 : index
    %c0_21 = arith.constant 0 : index
    %23 = vector.load %arg9[%c0_20, %c0_21] : memref<1x128xf32, #tpu.memory_space<vmem>>, vector<1x128xf32>
    %24 = vector.broadcast %23 : vector<1x128xf32> to vector<8x128xf32>
    %25 = arith.addf %22, %24 : vector<8x128xf32>
    %c0_22 = arith.constant 0 : index
    %c0_23 = arith.constant 0 : index
    %26 = vector.load %arg10[%c0_22, %c0_23] : memref<8x128xf32, #tpu.memory_space<vmem>>, vector<8x128xf32>
    tpu.vector_store %arg10[%c0_22, %c0_23], %25 {strides = array<i32>} : memref<8x128xf32, #tpu.memory_space<vmem>>, vector<8x128xf32>,
    return
  }
  func.func @transform_0(%arg0: i32) -> (i32, i32) {
    %c0_i32 = arith.constant 0 : i32
    %c0_i32_0 = arith.constant 0 : i32
    return %arg0, %c0_i32 : i32, i32
  }
  func.func @transform_1(%arg0: i32) -> (i32, i32) {
    %c0_i32 = arith.constant 0 : i32
    %c0_i32_0 = arith.constant 0 : i32
    return %arg0, %c0_i32 : i32, i32
  }
  func.func @transform_2(%arg0: i32) -> (i32, i32) {
    %c0_i32 = arith.constant 0 : i32
    %c0_i32_0 = arith.constant 0 : i32
    %c0_i32_1 = arith.constant 0 : i32
    return %c0_i32, %c0_i32_0 : i32, i32
  }
  func.func @transform_3(%arg0: i32) -> (i32, i32) {
    %c0_i32 = arith.constant 0 : i32
    %c0_i32_0 = arith.constant 0 : i32
    %c0_i32_1 = arith.constant 0 : i32
    return %c0_i32, %c0_i32_0 : i32, i32
  }
  func.func @transform_4(%arg0: i32) -> (i32, i32) {
    %c0_i32 = arith.constant 0 : i32
    %c0_i32_0 = arith.constant 0 : i32
    %c0_i32_1 = arith.constant 0 : i32
    return %c0_i32, %c0_i32_0 : i32, i32
  }
  func.func @transform_5(%arg0: i32) -> (i32, i32) {
    %c0_i32 = arith.constant 0 : i32
    %c0_i32_0 = arith.constant 0 : i32
    %c0_i32_1 = arith.constant 0 : i32
    return %c0_i32, %c0_i32_0 : i32, i32
  }
  func.func @transform_6(%arg0: i32) -> (i32, i32) {
    %c0_i32 = arith.constant 0 : i32
    %c0_i32_0 = arith.constant 0 : i32
    %c0_i32_1 = arith.constant 0 : i32
    return %c0_i32, %c0_i32_0 : i32, i32
  }
  func.func @transform_7(%arg0: i32) -> (i32, i32) {
    %c0_i32 = arith.constant 0 : i32
    %c0_i32_0 = arith.constant 0 : i32
    %c0_i32_1 = arith.constant 0 : i32
    return %c0_i32, %c0_i32_0 : i32, i32
  }
  func.func @transform_8(%arg0: i32) -> (i32, i32) {
    %c0_i32 = arith.constant 0 : i32
    %c0_i32_0 = arith.constant 0 : i32
    %c0_i32_1 = arith.constant 0 : i32
    return %c0_i32, %c0_i32_0 : i32, i32
  }
  func.func @transform_9(%arg0: i32) -> (i32, i32) {
    %c0_i32 = arith.constant 0 : i32
    %c0_i32_0 = arith.constant 0 : i32
    return %arg0, %c0_i32 : i32, i32
  }
}

</mosaic_0001>

<bundles_post_ra>
// kernel: tpu_custom_call.1
= control target key start
LH: loop header
LB: loop body
LE: loop exit
PB: predicated region body
PF: predicated region fallthrough
CT: control target
= control target key end

     0   :  { %14 = vsyncpa [#allocation3], 0  ;;  %s1231_s0 = inlined_call_operand.hbm [shape: bf16[8,32], index: 0, kind: input, shape index: {}]   ;;  %s1232_s1 = inlined_call_operand.hbm [shape: bf16[8,12], index: 1, kind: input, shape index: {}]   ;;  %s1233_s2 = inlined_call_operand.hbm [shape: bf16[32,256], index: 2, kind: input, shape index: {}]   ;;  %s1234_s3 = inlined_call_operand.hbm [shape: bf16[12,256], index: 3, kind: input, shape index: {}]   ;;  %s1235_s4 = inlined_call_operand.vmem [shape: f32[1,256], index: 4, kind: input, shape index: {}]   ;;  %s1236_s5 = inlined_call_operand.hbm [shape: bf16[256,256], index: 5, kind: input, shape index: {}]   ;;  %s1237_s6 = inlined_call_operand.vmem [shape: f32[1,256], index: 6, kind: input, shape index: {}]   ;;  %s1238_s7 = inlined_call_operand.hbm [shape: bf16[256,128], index: 7, kind: input, shape index: {}]   ;;  %s1239_s8 = inlined_call_operand.vmem [shape: f32[1,128], index: 8, kind: input, shape index: {}]   ;;  %s1240_s9 = inlined_call_operand.hbm [shape: f32[8,128], index: 9, kind: output, shape index: {}]  }
   0x1   :  { %15 = vsyncpa [#allocation6], 0 }
   0x2   :  { %16 = vsyncpa [#allocation9], 0 }
   0x3   :  { %17 = vsyncpa [#allocation12], 0  ;;  %s35_s11 = sshll.u32 %s1232_s1, 4  ;;  %s36_s11 = int_to_ptr.hbm [resolvable:$true] %s35_s11 }
   0x4   :  { %18 = vsyncpa [#allocation4], 0  ;;  %s1136_s12 = smov [#allocation5]   ;;  %s58_s16 = sshll.u32 %s1234_s3, 4  ;;  %s59_s16 = int_to_ptr.hbm [resolvable:$true] %s58_s16 }
   0x5   :  { %s37_s13 = sshll.u32 %s1136_s12, 4  ;;  %s1137_s17 = smov [#allocation8]   ;;  %s38_s13 = int_to_ptr.vmem [resolvable:$true] %s37_s13 }
   0x6   :  { %40 = dma.hbm_to_vmem [thread:$0]  %s36_s11, 64, %s38_s13, [#allocation6]  }
   0x7   :  { %s60_s18 = sshll.u32 %s1137_s17, 4  ;;  %s24_s21 = sshll.u32 %s1231_s0, 4  ;;  %s61_s18 = int_to_ptr.vmem [resolvable:$true] %s60_s18  ;;  %s25_s21 = int_to_ptr.hbm [resolvable:$true] %s24_s21 }
   0x8   :  { %s1138_s1 = smov 128   ;;  %s1139_s22 = smov 8  }
   0x9   :  { %66 = dma.hbm_to_vmem [thread:$0]  %s59_s16, 256, %s61_s18, [#allocation9], %s1138_s1, %s1138_s1, %s1139_s22  }
   0xa   :  { %s45_s25 = sshll.u32 %s1233_s2, 4  ;;  %s1140_s26 = smov [#allocation2]   ;;  %s46_s25 = int_to_ptr.hbm [resolvable:$true] %s45_s25 }
   0xb   :  { %s26_s27 = sshll.u32 %s1140_s26, 4  ;;  %s1141_s3 = smov [#allocation7]   ;;  %s27_s27 = int_to_ptr.vmem [resolvable:$true] %s26_s27 }
   0xc   :  { %29 = dma.hbm_to_vmem [thread:$0]  %s25_s21, 64, %s27_s27, [#allocation3]  }
   0xd   :  { %s47_s28 = sshll.u32 %s1141_s3, 4  ;;  %s73_s0 = sshll.u32 %s1236_s5, 4  ;;  %s48_s28 = int_to_ptr.vmem [resolvable:$true] %s47_s28  ;;  %s74_s0 = int_to_ptr.hbm [resolvable:$true] %s73_s0 }
   0xe   :  { %53 = dma.hbm_to_vmem [thread:$0]  %s46_s25, 512, %s48_s28, [#allocation6], %s1138_s1, %s1138_s1, %s1139_s22  }
   0xf   :  { %s88_s12 = sshll.u32 %s1238_s7, 4  ;;  %s1142_s13 = smov [#allocation10]   ;;  %s89_s12 = int_to_ptr.hbm [resolvable:$true] %s88_s12 }
  0x10   :  { %s75_s2 = sshll.u32 %s1142_s13, 4  ;;  %s1143_s14 = smov [#allocation11]   ;;  %s76_s2 = int_to_ptr.vmem [resolvable:$true] %s75_s2 }
  0x11   :  { %81 = dma.hbm_to_vmem [thread:$0]  %s74_s0, 4096, %s76_s2, [#allocation9], %s1138_s1, %s1138_s1, %s1139_s22  }
  0x12   :  { %s90_s15 = sshll.u32 %s1143_s14, 4  ;;  %s1144_s16 = smov 64   ;;  %s91_s15 = int_to_ptr.vmem [resolvable:$true] %s90_s15 }
  0x13   :  { %s1145_s17 = smov 4  }
  0x14   :  { %96 = dma.hbm_to_vmem [thread:$0]  %s89_s12, 2048, %s91_s15, [#allocation12], %s1144_s16, %s1144_s16, %s1145_s17  }
  0x15   :  { %1126 = dma.done.wait [#allocation3], 64  }
  0x16   :  { %1127 = vsyncadd [#allocation3], 4294967232 }
  0x17   :  { %1128 = dma.done.wait [#allocation6], 576  }
  0x18   :  { %1129 = vsyncadd [#allocation6], 4294966720 }
  0x19   :  { %1130 = dma.done.wait [#allocation9], 4352  }
  0x1a   :  { %1131 = vsyncadd [#allocation9], 4294962944 }
  0x1b   :  { %1132 = dma.done.wait [#allocation12], 2048  }
  0x1c   :  { %1133 = vsyncadd [#allocation12], 4294965248  ;;  %vm144_vm0 = vcmask 1045504   ;;  %v674_v0 = vld [vmem:[#allocation8] sm:$0xf]  ;;  %vm140_vm1 = vcmask 97280  }
  0x1d   :  { %v897_v1 = vld [vmem:[#allocation8 + $0x4] sm:$0x30]  ;;  %v896_v2 = vld [vmem:[#allocation8 + $0x4] sm:$0xf]  ;;  %v676_v4 = vld [vmem:[#allocation8 + $0x8] sm:$0x30] }
  0x1e   :  { %v675_v3 = vor.u32 %v897_v1, %v674_v0  ;;  %v692_v5 = vld [vmem:[#allocation7 + $0x10] sm:$0xf]  ;;  %v679_v6 = vor.u32 %v896_v2, %v676_v4  ;;  %v129_v7 = vld [vmem:[#allocation5] sm:$0xf]  ;;  %v895_v8 = vld [vmem:[#allocation7 + $0x14] sm:$0xf0] }
  0x1f   :  { %v894_v9 = vld [vmem:[#allocation7 + $0x14] sm:$0xf]  ;;  %v694_v10 = vld [vmem:[#allocation7 + $0x18] sm:$0xf0]  ;;  %v693_v12 = vor.u32 %v895_v8, %v692_v5  ;;  %v684_v14 = vld [vmem:[#allocation7] sm:$0xf] }
  0x20   :  { %v146_v11 = vsel %vm144_vm0, %v675_v3, 0  ;;  %v697_v13 = vor.u32 %v894_v9, %v694_v10  ;;  %v893_v15 = vld [vmem:[#allocation7 + $0x4] sm:$0xf0]  ;;  %v149_v16 = vsel %vm144_vm0, %v679_v6, 0  ;;  %v892_v17 = vld [vmem:[#allocation7 + $0x4] sm:$0xf] }
  0x21   :  { %158 = vmatpush.bf16.msra.mxu2 %v146_v11  ;;  %v686_v18 = vld [vmem:[#allocation7 + $0x8] sm:$0xf0]  ;;  %171 = vmatpush.bf16.msra.mxu3 %v149_v16  ;;  %v685_v19 = vor.u32 %v893_v15, %v684_v14  ;;  %v758_v20 = vld [vmem:[#allocation10 + $0x70] sm:$0xf]  ;;  %v913_v21 = vld [vmem:[#allocation10 + $0x74] sm:$0xf0] }
  0x22   :  { %v689_v22 = vor.u32 %v892_v17, %v686_v18  ;;  %v759_v23 = vor.u32 %v913_v21, %v758_v20  ;;  %v822_v24 = vld [vmem:[#allocation10 + $0xf0] sm:$0xf]  ;;  %v929_v25 = vld [vmem:[#allocation10 + $0xf4] sm:$0xf0]  ;;  %v912_v26 = vld [vmem:[#allocation10 + $0x74] sm:$0xf] }
  0x23   :  { %v823_v27 = vor.u32 %v929_v25, %v822_v24  ;;  %v760_v28 = vld [vmem:[#allocation10 + $0x78] sm:$0xf0]  ;;  %v928_v29 = vld [vmem:[#allocation10 + $0xf4] sm:$0xf]  ;;  %v750_v33 = vld [vmem:[#allocation10 + $0x60] sm:$0xf] }
  0x24   :  { %680 = vmatmul.msk.bf16.vlgmr.msra.gmra.mxu2 %vm140_vm1, %v129_v7  ;;  %v824_v30 = vld [vmem:[#allocation10 + $0xf8] sm:$0xf0]  ;;  %681 = vmatmul.msk.bf16.vlgmr.msra.gmra.mxu3 %vm140_vm1, %v129_v7  ;;  %v763_v31 = vor.u32 %v912_v26, %v760_v28  ;;  %v911_v34 = vld [vmem:[#allocation10 + $0x64] sm:$0xf0]  ;;  %v814_v35 = vld [vmem:[#allocation10 + $0xe0] sm:$0xf] }
  0x25   :  { %207 = vmatpush.bf16.msrb.mxu2 %v693_v12  ;;  %220 = vmatpush.bf16.msrb.mxu3 %v697_v13  ;;  %v827_v32 = vor.u32 %v928_v29, %v824_v30  ;;  %v751_v36 = vor.u32 %v911_v34, %v750_v33  ;;  %v927_v37 = vld [vmem:[#allocation10 + $0xe4] sm:$0xf0]  ;;  %v910_v38 = vld [vmem:[#allocation10 + $0x64] sm:$0xf]  ;;  %v752_v39 = vld [vmem:[#allocation10 + $0x68] sm:$0xf0] }
  0x26   :  { %437 = vmatpush.bf16.msra.mxu0 %v759_v23  ;;  %450 = vmatpush.bf16.msra.mxu1 %v823_v27  ;;  %v815_v40 = vor.u32 %v927_v37, %v814_v35  ;;  %v755_v41 = vor.u32 %v910_v38, %v752_v39  ;;  %v926_v42 = vld [vmem:[#allocation10 + $0xe4] sm:$0xf]  ;;  %v816_v43 = vld [vmem:[#allocation10 + $0xe8] sm:$0xf0]  ;;  %v124_v45 = vld [vmem:[#allocation2] sm:$0xf] }
  0x27   :  { %v819_v44 = vor.u32 %v926_v42, %v816_v43  ;;  %vm197_vm2 = vcmask 261120   ;;  %v742_v46 = vld [vmem:[#allocation10 + $0x50] sm:$0xf]  ;;  %v909_v47 = vld [vmem:[#allocation10 + $0x54] sm:$0xf0]  ;;  %s1146_s20 = smov [#allocation13]  }
  0x28   :  { %v806_v48 = vld [vmem:[#allocation10 + $0xd0] sm:$0xf]  ;;  %v743_v49 = vor.u32 %v909_v47, %v742_v46  ;;  %v925_v50 = vld [vmem:[#allocation10 + $0xd4] sm:$0xf0]  ;;  %v908_v51 = vld [vmem:[#allocation10 + $0x54] sm:$0xf] }
  0x29   :  { %208 = vmatpush.bf16.msrb.mxu2 %v685_v19  ;;  %221 = vmatpush.bf16.msrb.mxu3 %v689_v22  ;;  %v744_v52 = vld [vmem:[#allocation10 + $0x58] sm:$0xf0]  ;;  %v807_v53 = vor.u32 %v925_v50, %v806_v48  ;;  %v924_v55 = vld [vmem:[#allocation10 + $0xd4] sm:$0xf]  ;;  %v734_v57 = vld [vmem:[#allocation10 + $0x40] sm:$0xf] }
  0x2a   :  { %438 = vmatpush.bf16.msra.mxu0 %v751_v36  ;;  %451 = vmatpush.bf16.msra.mxu1 %v815_v40  ;;  %v747_v54 = vor.u32 %v908_v51, %v744_v52  ;;  %v808_v56 = vld [vmem:[#allocation10 + $0xd8] sm:$0xf0]  ;;  %v907_v59 = vld [vmem:[#allocation10 + $0x44] sm:$0xf0]  ;;  %v798_v60 = vld [vmem:[#allocation10 + $0xc0] sm:$0xf] }
  0x2b   :  { %v811_v58 = vor.u32 %v924_v55, %v808_v56  ;;  %v923_v61 = vld [vmem:[#allocation10 + $0xc4] sm:$0xf0]  ;;  %v735_v62 = vor.u32 %v907_v59, %v734_v57  ;;  %v906_v0 = vld [vmem:[#allocation10 + $0x44] sm:$0xf]  ;;  %v736_v1 = vld [vmem:[#allocation10 + $0x48] sm:$0xf0] }
  0x2c   :  { %v799_v63 = vor.u32 %v923_v61, %v798_v60  ;;  %v922_v2 = vld [vmem:[#allocation10 + $0xc4] sm:$0xf]  ;;  %v739_v3 = vor.u32 %v906_v0, %v736_v1  ;;  %v800_v4 = vld [vmem:[#allocation10 + $0xc8] sm:$0xf0]  ;;  %v726_v6 = vld [vmem:[#allocation10 + $0x30] sm:$0xf] }
  0x2d   :  { %463 = vmatpush.bf16.msra.mxu2 %v763_v31  ;;  %476 = vmatpush.bf16.msra.mxu3 %v827_v32  ;;  %v803_v5 = vor.u32 %v922_v2, %v800_v4  ;;  %v905_v7 = vld [vmem:[#allocation10 + $0x34] sm:$0xf0]  ;;  %v790_v8 = vld [vmem:[#allocation10 + $0xb0] sm:$0xf]  ;;  %v904_v11 = vld [vmem:[#allocation10 + $0x34] sm:$0xf] }
  0x2e   :  { %439 = vmatpush.bf16.msra.mxu0 %v743_v49  ;;  %452 = vmatpush.bf16.msra.mxu1 %v807_v53  ;;  %v727_v9 = vor.u32 %v905_v7, %v726_v6  ;;  %v921_v10 = vld [vmem:[#allocation10 + $0xb4] sm:$0xf0]  ;;  %v728_v12 = vld [vmem:[#allocation10 + $0x38] sm:$0xf0]  ;;  %v920_v15 = vld [vmem:[#allocation10 + $0xb4] sm:$0xf] }
  0x2f   :  { %v791_v13 = vor.u32 %v921_v10, %v790_v8  ;;  %v731_v14 = vor.u32 %v904_v11, %v728_v12  ;;  %v792_v16 = vld [vmem:[#allocation10 + $0xb8] sm:$0xf0]  ;;  %v718_v17 = vld [vmem:[#allocation10 + $0x20] sm:$0xf]  ;;  %v903_v19 = vld [vmem:[#allocation10 + $0x24] sm:$0xf0] }
  0x30   :  { %v795_v18 = vor.u32 %v920_v15, %v792_v16  ;;  %v782_v20 = vld [vmem:[#allocation10 + $0xa0] sm:$0xf]  ;;  %v919_v21 = vld [vmem:[#allocation10 + $0xa4] sm:$0xf0]  ;;  %v719_v22 = vor.u32 %v903_v19, %v718_v17  ;;  %v902_v24 = vld [vmem:[#allocation10 + $0x24] sm:$0xf] }
  0x31   :  { %464 = vmatpush.bf16.msra.mxu2 %v755_v41  ;;  %477 = vmatpush.bf16.msra.mxu3 %v819_v44  ;;  %v783_v23 = vor.u32 %v919_v21, %v782_v20  ;;  %v720_v25 = vld [vmem:[#allocation10 + $0x28] sm:$0xf0]  ;;  %v918_v26 = vld [vmem:[#allocation10 + $0xa4] sm:$0xf]  ;;  %v710_v30 = vld [vmem:[#allocation10 + $0x10] sm:$0xf] }
  0x32   :  { %440 = vmatpush.bf16.msra.mxu0 %v735_v62  ;;  %453 = vmatpush.bf16.msra.mxu1 %v799_v63  ;;  %v723_v27 = vor.u32 %v902_v24, %v720_v25  ;;  %v784_v28 = vld [vmem:[#allocation10 + $0xa8] sm:$0xf0]  ;;  %v901_v31 = vld [vmem:[#allocation10 + $0x14] sm:$0xf0]  ;;  %v774_v32 = vld [vmem:[#allocation10 + $0x90] sm:$0xf] }
  0x33   :  { %v787_v29 = vor.u32 %v918_v26, %v784_v28  ;;  %v711_v33 = vor.u32 %v901_v31, %v710_v30  ;;  %v917_v34 = vld [vmem:[#allocation10 + $0x94] sm:$0xf0]  ;;  %v900_v35 = vld [vmem:[#allocation10 + $0x14] sm:$0xf]  ;;  %v712_v36 = vld [vmem:[#allocation10 + $0x18] sm:$0xf0] }
  0x34   :  { %698 = vmatmul.msk.bf16.vlgmr.msrb.gmra.mxu2 %vm197_vm2, %v124_v45  ;;  %699 = vmatmul.msk.bf16.vlgmr.msrb.gmra.mxu3 %vm197_vm2, %v124_v45  ;;  %v775_v37 = vor.u32 %v917_v34, %v774_v32  ;;  %v715_v38 = vor.u32 %v900_v35, %v712_v36  ;;  %v916_v39 = vld [vmem:[#allocation10 + $0x94] sm:$0xf]  ;;  %v776_v40 = vld [vmem:[#allocation10 + $0x98] sm:$0xf0]  ;;  %v702_v41 = vld [vmem:[#allocation10] sm:$0xf] }
  0x35   :  { %465 = vmatpush.bf16.msra.mxu2 %v747_v54  ;;  %478 = vmatpush.bf16.msra.mxu3 %v811_v58  ;;  %v779_v42 = vor.u32 %v916_v39, %v776_v40  ;;  %v899_v43 = vld [vmem:[#allocation10 + $0x4] sm:$0xf0]  ;;  %v766_v44 = vld [vmem:[#allocation10 + $0x80] sm:$0xf]  ;;  %v898_v48 = vld [vmem:[#allocation10 + $0x4] sm:$0xf] }
  0x36   :  { %441 = vmatpush.bf16.msra.mxu0 %v727_v9  ;;  %454 = vmatpush.bf16.msra.mxu1 %v791_v13  ;;  %v915_v45 = vld [vmem:[#allocation10 + $0x84] sm:$0xf0]  ;;  %v703_v46 = vor.u32 %v899_v43, %v702_v41  ;;  %v704_v49 = vld [vmem:[#allocation10 + $0x8] sm:$0xf0]  ;;  %v914_v50 = vld [vmem:[#allocation10 + $0x84] sm:$0xf] }
  0x37   :  { %v767_v47 = vor.u32 %v915_v45, %v766_v44  ;;  %v707_v51 = vor.u32 %v898_v48, %v704_v49  ;;  %v768_v52 = vld [vmem:[#allocation10 + $0x88] sm:$0xf0]  ;;  %v937_v54 = vld [vmem:[#allocation11 + $0x38] sm:$0xff]  ;;  %v936_v56 = vld [vmem:[#allocation11 + $0x30] sm:$0xff]  ;;  %s657_s21 = sshll.u32 %s1146_s20, 4  ;;  %s659_s23 = sshll.u32 %s1240_s9, 4  ;;  %s658_s21 = int_to_ptr.vmem [resolvable:$true] %s657_s21  ;;  %s660_s23 = int_to_ptr.hbm [resolvable:$true] %s659_s23 }
  0x38   :  { %v771_v53 = vor.u32 %v914_v50, %v768_v52  ;;  %v945_v55 = vld [vmem:[#allocation11 + $0x78] sm:$0xff]  ;;  %v944_v57 = vld [vmem:[#allocation11 + $0x70] sm:$0xff]  ;;  %v935_v59 = vld [vmem:[#allocation11 + $0x28] sm:$0xff] }
  0x39   :  { %466 = vmatpush.bf16.msra.mxu2 %v739_v3  ;;  %479 = vmatpush.bf16.msra.mxu3 %v803_v5  ;;  %v943_v60 = vld [vmem:[#allocation11 + $0x68] sm:$0xff]  ;;  %v934_v62 = vld [vmem:[#allocation11 + $0x20] sm:$0xff]  ;;  %v933_v1 = vld [vmem:[#allocation11 + $0x18] sm:$0xff] }
  0x3a   :  { %442 = vmatpush.bf16.msra.mxu0 %v719_v22  ;;  %455 = vmatpush.bf16.msra.mxu1 %v783_v23  ;;  %v942_v63 = vld [vmem:[#allocation11 + $0x60] sm:$0xff]  ;;  %v227_v3 = vld [vmem:[%s1235_s4] sm:$0x3]  ;;  %v932_v4 = vld [vmem:[#allocation11 + $0x10] sm:$0xff] }
  0x3b   :  { %v229_v5 = vperm.slane %v227_v3, 0  ;;  %v230_v7 = vperm.slane %v227_v3, 1  ;;  %v941_v19 = vld [vmem:[#allocation11 + $0x58] sm:$0xff]  ;;  %v931_v20 = vld [vmem:[#allocation11 + $0x8] sm:$0xff]  ;;  %v940_v21 = vld [vmem:[#allocation11 + $0x50] sm:$0xff] }
  0x3c   :  { %v930_v22 = vld [vmem:[#allocation11] sm:$0xff]  ;;  %v939_v23 = vld [vmem:[#allocation11 + $0x48] sm:$0xff] }
  0x3d   :  { %467 = vmatpush.bf16.msra.mxu2 %v731_v14  ;;  %480 = vmatpush.bf16.msra.mxu3 %v795_v18  ;;  %v938_v24 = vld [vmem:[#allocation11 + $0x40] sm:$0xff]  ;;  %v271_v25 = vld [vmem:[%s1237_s6] sm:$0x3] }
  0x3e   :  { %443 = vmatpush.bf16.msra.mxu0 %v711_v33  ;;  %456 = vmatpush.bf16.msra.mxu1 %v775_v37  ;;  %v273_v26 = vperm.slane %v271_v25, 0  ;;  %v274_v31 = vperm.slane %v271_v25, 1  ;;  %v957_v45 = vld [vmem:[%s1239_s8] ss:$0 sm:$0xff] }
  0x41   :  { %468 = vmatpush.bf16.msra.mxu2 %v723_v27  ;;  %481 = vmatpush.bf16.msra.mxu3 %v787_v29 }
  0x42   :  { %444 = vmatpush.bf16.msra.mxu0 %v703_v46  ;;  %457 = vmatpush.bf16.msra.mxu1 %v767_v47 }
  0x45   :  { %469 = vmatpush.bf16.msra.mxu2 %v715_v38  ;;  %482 = vmatpush.bf16.msra.mxu3 %v779_v42 }
  0x46   :  { %625 = vmatpush.bf16.msrb.mxu0 %v937_v54  ;;  %638 = vmatpush.bf16.msrb.mxu1 %v945_v55 }
  0x49   :  { %470 = vmatpush.bf16.msra.mxu2 %v707_v51  ;;  %483 = vmatpush.bf16.msra.mxu3 %v771_v53 }
  0x4a   :  { %626 = vmatpush.bf16.msrb.mxu0 %v936_v56  ;;  %639 = vmatpush.bf16.msrb.mxu1 %v944_v57 }
  0x4e   :  { %627 = vmatpush.bf16.msrb.mxu0 %v935_v59  ;;  %640 = vmatpush.bf16.msrb.mxu1 %v943_v60 }
  0x52   :  { %628 = vmatpush.bf16.msrb.mxu0 %v934_v62  ;;  %641 = vmatpush.bf16.msrb.mxu1 %v942_v63 }
  0x56   :  { %629 = vmatpush.bf16.msrb.mxu0 %v933_v1  ;;  %642 = vmatpush.bf16.msrb.mxu1 %v941_v19 }
  0x5a   :  { %630 = vmatpush.bf16.msrb.mxu0 %v932_v4  ;;  %643 = vmatpush.bf16.msrb.mxu1 %v940_v21 }
  0x5e   :  { %631 = vmatpush.bf16.msrb.mxu0 %v931_v20  ;;  %644 = vmatpush.bf16.msrb.mxu1 %v939_v23 }
  0x62   :  { %632 = vmatpush.bf16.msrb.mxu0 %v930_v22  ;;  %645 = vmatpush.bf16.msrb.mxu1 %v938_v24 }
  0xa7   :  { %v160_v58 = vpop.f32.mrf.mxu2  ;;  %v173_v61 = vpop.f32.mrf.mxu3 }
  0xaf   :  { %v162_v0 = vpop.f32.mrf.mxu2  ;;  %v175_v2 = vpop.f32.mrf.mxu3 }
  0xb7   :  { %v210_v6 = vpop.f32.mrf.mxu2  ;;  %v223_v9 = vpop.f32.mrf.mxu3 }
  0xb8   :  { %v211_v8 = vadd.f32 %v210_v6, %v160_v58  ;;  %v224_v10 = vadd.f32 %v223_v9, %v173_v61 }
  0xba   :  { %v233_v11 = vadd.f32 %v229_v5, %v211_v8  ;;  %v234_v12 = vadd.f32 %v230_v7, %v224_v10 }
  0xbc   :  { %v235_v13 = vmax.f32 %v233_v11, 0.0  ;;  %v236_v14 = vmax.f32 %v234_v12, 0.0 }
  0xbe   :  { %v237_v15 = vpack.c.bf16 %v235_v13, %v235_v13  ;;  %v238_v17 = vpack.c.bf16 %v236_v14, %v236_v14 }
  0xbf   :  { %v212_v16 = vpop.f32.mrf.mxu2  ;;  %v225_v18 = vpop.f32.mrf.mxu3 }
  0xc0   :  { %445 = vmatmul.bf16.vlgmr.msra.gmra.mxu0 %v237_v15  ;;  %471 = vmatmul.bf16.vlgmr.msra.gmra.mxu2 %v237_v15 }
  0xc1   :  { %458 = vmatmul.bf16.vlgmr.msra.gmra.mxu1 %v238_v17  ;;  %484 = vmatmul.bf16.vlgmr.msra.gmra.mxu3 %v238_v17 }
 0x13d   :  { %v446_v27 = vpop.f32.mrf.mxu0 }
 0x13e   :  { %v447_v28 = vadd.f32 %v446_v27, %v273_v26  ;;  %v459_v29 = vpop.f32.mrf.mxu1 }
 0x140   :  { %v460_v30 = vadd.f32 %v459_v29, %v447_v28 }
 0x142   :  { %v489_v32 = vmax.f32 %v460_v30, 0.0 }
 0x143   :  { %v472_v33 = vpop.f32.mrf.mxu2 }
 0x144   :  { %v491_v34 = vpack.c.bf16 %v489_v32, %v489_v32  ;;  %v473_v35 = vadd.f32 %v472_v33, %v274_v31  ;;  %v485_v36 = vpop.f32.mrf.mxu3 }
 0x145   :  { %v448_v37 = vpop.f32.mrf.mxu0 }
 0x146   :  { %v486_v38 = vadd.f32 %v485_v36, %v473_v35  ;;  %v461_v39 = vpop.f32.mrf.mxu1  ;;  %633 = vmatmul.bf16.vlgmr.msrb.gmra.mxu0 %v491_v34 }
 0x148   :  { %v490_v40 = vmax.f32 %v486_v38, 0.0 }
 0x14a   :  { %v492_v41 = vpack.c.bf16 %v490_v40, %v490_v40 }
 0x14b   :  { %v474_v42 = vpop.f32.mrf.mxu2 }
 0x14c   :  { %v487_v43 = vpop.f32.mrf.mxu3  ;;  %646 = vmatmul.bf16.vlgmr.msrb.gmra.mxu1 %v492_v41 }
 0x1c3   :  { %v634_v44 = vpop.f32.mrf.mxu0 }
 0x1c4   :  { %v635_v46 = vadd.f32 %v957_v45, %v634_v44 }
 0x1c9   :  { %v647_v47 = vpop.f32.mrf.mxu1 }
 0x1ca   :  { %v648_v48 = vadd.f32 %v647_v47, %v635_v46 }
 0x1cb   :  { %v636_v49 = vpop.f32.mrf.mxu0 }
 0x1cc   :  { %651 = vst [vmem:[#allocation13] sm:$0xff] %v648_v48 }
 0x1cd   :  { %662 = dma.vmem_to_hbm [thread:$0]  %s658_s21, 128, %s660_s23, [#allocation4]  }
 0x1d1   :  { %v649_v50 = vpop.f32.mrf.mxu1 }
 0x1d2   :  { %1134 = dma.done.wait [#allocation4], 128  }
 0x1d3   :  { %1135 = vsyncadd [#allocation4], 4294967168 }
 0x1d4   :  { %667 = vsyncpa [#allocation3], 1 }
 0x1d5   :  { %668 = vsyncpa [#allocation6], 1 }
 0x1d6   :  { %669 = vsyncpa [#allocation9], 1 }
 0x1d7   :  { %670 = vsyncpa [#allocation12], 1 }
 0x1d8   :  { %671 = vsyncpa [#allocation4], 1 }

</bundles_post_ra>
